<compile_context>
chip_gen: v6e
topology: v6e:2x2x1
jax: 0.10.0
libtpu: 0.0.40
codegen_flags: <defaults>
</compile_context>

<pallas_src>
import functools

import jax
import jax.numpy as jnp
from jax import lax
from jax.experimental import pallas as pl
from jax.experimental.pallas import tpu as pltpu


def _round_up(n, m):
    return ((n + m - 1) // m) * m


def _vmem_capacity_bytes():
    """Best-effort query of per-core VMEM capacity (conservative fallback)."""
    try:
        info = pltpu.get_tpu_info()
        cap = getattr(info, "vmem_capacity_bytes", None)
        if cap:
            return int(cap)
    except Exception:
        pass
    return 64 * 1024 * 1024          # v7x: 64 MiB per TensorCore


def _vmem_estimate(tq, np_, cp, c8p, attn_bytes):
    """Per-step VMEM: double-buffered pipeline blocks + live intermediates."""
    f32, bf16 = 4, 2
    blocks = (2 * tq * cp * f32            # x residual tile (f32)
              + 2 * tq * c8p * bf16        # q tile
              + 2 * c8p * np_ * bf16       # k^T (q-invariant, still 2 bufs)
              + 2 * np_ * cp * bf16        # v (+ fused-denominator lane)
              + 2 * tq * cp * f32          # out tile
              + 2 * tq * np_ * attn_bytes)  # attention tile
    temps = (3 * tq * np_ * f32            # energy / shifted / exp f32 copies
             + tq * np_ * bf16             # bf16 cast of exp for the AV matmul
             + 2 * tq * cp * f32)          # o accumulator + out staging
    return blocks + temps


def _choose_tiling(n, cp, c8p, attn_bytes):
    """Pick (Np, TQ, vmem_limit_bytes) for this chip's VMEM size."""
    np_ = _round_up(n, 128)
    cap = _vmem_capacity_bytes()
    if cap >= 96 * 1024 * 1024:            # v5e / v6e: 128 MiB physical VMEM
        budget, hard_cap, tq_max = 96 << 20, 108 << 20, 512
    else:                                  # v7x: 64 MiB per TensorCore
        budget, hard_cap, tq_max = 40 << 20, 52 << 20, 256
    candidates = [t for t in (512, 256, 128)
                  if t <= tq_max and t <= np_ and np_ % t == 0]
    if not candidates:
        candidates = [128]
    tq = candidates[-1]                    # floor: smallest lane-dense tile
    for t in candidates:                   # largest tile that fits the budget
        if _vmem_estimate(t, np_, cp, c8p, attn_bytes) <= budget:
            tq = t
            break
    est = _vmem_estimate(tq, np_, cp, c8p, attn_bytes)
    vmem_limit = int(min(hard_cap, max(32 << 20, int(1.25 * est) + (4 << 20))))
    return np_, tq, vmem_limit


def _attn_kernel(x_ref, q_ref, kT_ref, v_ref, gamma_ref, out_ref, attn_ref,
                 *, n_real, denom_lane):
    q = q_ref[0]                           # (TQ, C8p)  bf16
    kT = kT_ref[0]                         # (C8p, Np)  bf16

    # energy[i, j] = <q_i, k_j> : plain MXU matmul, f32 accumulation.
    energy = jnp.dot(q, kT, preferred_element_type=jnp.float32)     # (TQ, Np)

    if energy.shape[-1] != n_real:         # static branch: mask padded keys
        col = lax.broadcasted_iota(jnp.int32, energy.shape, 1)
        energy = jnp.where(col < n_real, energy, jnp.float32(-1e30))

    # Row-wise softmax numerator in f32 (exp on the EUP).
    m = jnp.max(energy, axis=-1, keepdims=True)
    e = jnp.exp(energy - m)                                          # (TQ, Np)
    e_bf = e.astype(jnp.bfloat16)

    # o[:, :C] = e @ V.  A 1.0 planted in padded lane `denom_lane` of V makes
    # the MXU also produce the softmax denominator in that column.
    o = jnp.dot(e_bf, v_ref[0], preferred_element_type=jnp.float32)  # (TQ, Cp)
    if denom_lane is not None:
        lane = lax.broadcasted_iota(jnp.int32, o.shape, 1)
        denom = jnp.sum(jnp.where(lane == denom_lane, o, 0.0),
                        axis=-1, keepdims=True)                      # 1-vreg reduce
    else:
        denom = jnp.sum(e, axis=-1, keepdims=True)                   # fallback
    inv = pl.reciprocal(denom, approx=True)                          # EUP slot

    attn_ref[0] = (e * inv).astype(attn_ref.dtype)
    gamma = gamma_ref[0, 0]
    out_ref[0] = gamma * (o * inv) + x_ref[0]


def self_attn(x_nchw, params, attn_dtype=jnp.bfloat16):
    """x_nchw: (B, C, W, H) float32. Returns (out (B,C,W,H), attention (B,N,N))."""
    B, C, W, H = x_nchw.shape
    N = W * H
    wq, bq, wk, bk, wv, bv, gamma = params
    C8 = wq.shape[1]

    Cp = _round_up(C, 128)                 # lane-dense channel padding
    C8p = _round_up(C8, 128)
    attn_bytes = jnp.dtype(attn_dtype).itemsize
    Np, TQ, vmem_limit = _choose_tiling(N, Cp, C8p, attn_bytes)

    # NCHW -> (B, N, C), matching torch's .view(B, C, W*H) flatten order.
    x_nc = jnp.transpose(x_nchw, (0, 2, 3, 1)).reshape(B, N, C)

    # 1x1-conv projections as tight XLA matmuls (hoisted out of the kernel so
    # the q axis carries no scratch state and K is transposed only once).
    q = x_nc @ wq + bq                     # (B, N, C8)
    k = x_nc @ wk + bk                     # (B, N, C8)
    v = x_nc @ wv + bv                     # (B, N, C)

    # Lane-dense, zero-padded bf16 kernel operands.
    q_p = jnp.zeros((B, Np, C8p), jnp.bfloat16
                    ).at[:, :N, :C8].set(q.astype(jnp.bfloat16))
    kT_p = jnp.zeros((B, C8p, Np), jnp.bfloat16
                     ).at[:, :C8, :N].set(jnp.swapaxes(k, 1, 2).astype(jnp.bfloat16))
    v_p = jnp.zeros((B, Np, Cp), jnp.bfloat16
                    ).at[:, :N, :C].set(v.astype(jnp.bfloat16))

    # Plant 1.0 in a free padded lane of V (real key rows only) so the AV
    # matmul also yields the softmax denominator.  No free lane if C % 128 == 0.
    denom_lane = C if (C % 128) != 0 else None
    if denom_lane is not None:
        v_p = v_p.at[:, :N, denom_lane].set(jnp.bfloat16(1.0))

    x_p = jnp.zeros((B, Np, Cp), jnp.float32).at[:, :N, :C].set(x_nc)
    gamma_s = jnp.reshape(gamma, (1, 1)).astype(jnp.float32)

    kernel = functools.partial(_attn_kernel, n_real=N, denom_lane=denom_lane)

    grid_spec = pltpu.PrefetchScalarGridSpec(
        num_scalar_prefetch=0,
        grid=(B, Np // TQ),
        in_specs=[
            pl.BlockSpec((1, TQ, Cp), lambda b, i: (b, i, 0)),    # x residual
            pl.BlockSpec((1, TQ, C8p), lambda b, i: (b, i, 0)),   # q tile
            pl.BlockSpec((1, C8p, Np), lambda b, i: (b, 0, 0)),   # k^T (per-b)
            pl.BlockSpec((1, Np, Cp), lambda b, i: (b, 0, 0)),    # v (per-b)
            pl.BlockSpec(memory_space=pltpu.MemorySpace.SMEM),    # gamma scalar
        ],
        out_specs=[
            pl.BlockSpec((1, TQ, Cp), lambda b, i: (b, i, 0)),    # out tile
            pl.BlockSpec((1, TQ, Np), lambda b, i: (b, i, 0)),    # attention tile
        ],
    )

    out_nc, attn = pl.pallas_call(
        kernel,
        out_shape=(
            jax.ShapeDtypeStruct((B, Np, Cp), jnp.float32),
            jax.ShapeDtypeStruct((B, Np, Np), attn_dtype),
        ),
        grid_spec=grid_spec,
        compiler_params=pltpu.CompilerParams(
            dimension_semantics=("parallel", "parallel"),
            vmem_limit_bytes=vmem_limit),
    )(x_p, q_p, kT_p, v_p, gamma_s)

    out_nchw = jnp.transpose(out_nc[:, :N, :C].reshape(B, W, H, C), (0, 3, 1, 2))
    return out_nchw, attn[:, :N, :N]


def init_params(key, in_dim):
    """Deterministic parameter init. Shapes follow Self_Attn.__init__."""
    c8 = in_dim // 8
    kq, kk, kv, kbq, kbk, kbv = jax.random.split(key, 6)
    # Stored as (C_in, C_out) so projections are x @ W; equals conv weight.T.
    wq = jax.random.normal(kq, (in_dim, c8), jnp.float32) * 0.1
    wk = jax.random.normal(kk, (in_dim, c8), jnp.float32) * 0.1
    wv = jax.random.normal(kv, (in_dim, in_dim), jnp.float32) * 0.1
    bq = jax.random.normal(kbq, (1, c8), jnp.float32) * 0.1
    bk = jax.random.normal(kbk, (1, c8), jnp.float32) * 0.1
    bv = jax.random.normal(kbv, (1, in_dim), jnp.float32) * 0.1
    gamma = jnp.zeros((1, 1), jnp.float32)  # nn.Parameter(torch.zeros(1))
    return (wq, bq, wk, bk, wv, bv, gamma)


def _reference(x, params):
    """Pure-JAX f32 reference mirroring the PyTorch forward."""
    wq, bq, wk, bk, wv, bv, gamma = params
    B, C, W, H = x.shape
    N = W * H
    xf = jnp.transpose(x, (0, 2, 3, 1)).reshape(B, N, C)
    q = xf @ wq + bq
    k = xf @ wk + bk
    v = xf @ wv + bv
    energy = jnp.einsum('bnc,bmc->bnm', q, k)
    attn = jax.nn.softmax(energy, axis=-1)
    o = jnp.einsum('bnm,bmc->bnc', attn, v)
    out = gamma[0, 0] * o + xf
    out = jnp.transpose(out.reshape(B, W, H, C), (0, 3, 1, 2))
    return out, attn


if __name__ == "__main__":
    key = jax.random.PRNGKey(0)
    kx, kp = jax.random.split(key)

    B, C, W, H = 2, 16, 8, 8                                  # in_dim=16 -> C//8=2
    x = jax.random.normal(kx, (B, C, W, H), jnp.float32)
    params = init_params(kp, C)
    # Use a nonzero gamma so the attention path actually contributes to `out`.
    params = params[:-1] + (jnp.full((1, 1), 0.5, jnp.float32),)

    out, attn = self_attn(x, params)
    out = jax.block_until_ready(out)
    attn = jax.block_until_ready(attn)

    out_ref, attn_ref = _reference(x, params)
    # bf16 matmul operands / bf16 attention output vs f32 reference.
    assert out.shape == (B, C, W, H) and attn.shape == (B, W * H, W * H)
    assert jnp.allclose(attn.astype(jnp.float32), attn_ref, atol=3e-2, rtol=3e-2)
    assert jnp.allclose(out, out_ref, atol=3e-2, rtol=3e-2)

    print("KERNEL_OK")
</pallas_src>

<mosaic_0001>
module attributes {stable_mosaic.version = 11 : i64} {
  func.func @_attn_kernel(%arg0: i32, %arg1: i32, %arg2: memref<1x128x128xf32, #tpu.memory_space<vmem>>, %arg3: memref<1x128x128xbf16, #tpu.memory_space<vmem>>, %arg4: memref<1x128x128xbf16, #tpu.memory_space<vmem>>, %arg5: memref<1x128x128xbf16, #tpu.memory_space<vmem>>, %arg6: memref<1x1xf32, #tpu.memory_space<smem>>, %arg7: memref<1x128x128xf32, #tpu.memory_space<vmem>>, %arg8: memref<1x128x128xbf16, #tpu.memory_space<vmem>>) attributes {dimension_semantics = [#tpu.dimension_semantics<parallel>, #tpu.dimension_semantics<parallel>], iteration_bounds = array<i64: 2, 1>, scalar_prefetch = 0 : i64, scratch_operands = 0 : i64, tpu.core_type = #tpu.core_type<tc>, window_params = [{transform_indices = @transform_0, window_bounds = array<i64: 1, 128, 128>}, {transform_indices = @transform_1, window_bounds = array<i64: 1, 128, 128>}, {transform_indices = @transform_2, window_bounds = array<i64: 1, 128, 128>}, {transform_indices = @transform_3, window_bounds = array<i64: 1, 128, 128>}, {transform_indices = @transform_4, window_bounds = array<i64: 1, 1>}, {transform_indices = @transform_5, window_bounds = array<i64: 1, 128, 128>}, {transform_indices = @transform_6, window_bounds = array<i64: 1, 128, 128>}]} {
    %c0 = arith.constant 0 : index
    %c0_0 = arith.constant 0 : index
    %c0_1 = arith.constant 0 : index
    %0 = vector.load %arg3[%c0, %c0_0, %c0_1] : memref<1x128x128xbf16, #tpu.memory_space<vmem>>, vector<1x128x128xbf16>
    %1 = vector.shape_cast %0 : vector<1x128x128xbf16> to vector<128x128xbf16>
    %c0_2 = arith.constant 0 : index
    %c0_3 = arith.constant 0 : index
    %c0_4 = arith.constant 0 : index
    %2 = vector.load %arg4[%c0_2, %c0_3, %c0_4] : memref<1x128x128xbf16, #tpu.memory_space<vmem>>, vector<1x128x128xbf16>
    %3 = vector.shape_cast %2 : vector<1x128x128xbf16> to vector<128x128xbf16>
    %cst = arith.constant dense<0.000000e+00> : vector<128x128xf32>
    %4 = tpu.matmul %1, %3, %cst {dimension_numbers = #tpu.dot_dimension_numbers<[1], [0], [0], [1], [0, 0, 1, 1], [], []>} : vector<128x128xbf16>, vector<128x128xbf16>, vector<128x128xf32> -> vector<128x128xf32>
    %5 = tpu.iota {dimensions = array<i32: 1>} : vector<128x128xi32>
    %c64_i32 = arith.constant 64 : i32
    %6 = vector.broadcast %c64_i32 : i32 to vector<128x128xi32>
    %7 = arith.cmpi slt, %5, %6 : vector<128x128xi32>
    %cst_5 = arith.constant -1.000000e+30 : f32
    %8 = vector.broadcast %cst_5 : f32 to vector<128x128xf32>
    %9 = arith.select %7, %4, %8 : vector<128x128xi1>, vector<128x128xf32>
    %cst_6 = arith.constant dense<0xFF800000> : vector<128xf32>
    %10 = vector.multi_reduction <maximumf>, %9, %cst_6 [1] : vector<128x128xf32> to vector<128xf32>
    %11 = vector.shape_cast %10 : vector<128xf32> to vector<128x1xf32>
    %12 = vector.broadcast %11 : vector<128x1xf32> to vector<128x128xf32>
    %13 = arith.subf %9, %12 : vector<128x128xf32>
    %14 = math.exp %13 : vector<128x128xf32>
    %15 = arith.truncf %14 : vector<128x128xf32> to vector<128x128xbf16>
    %c0_7 = arith.constant 0 : index
    %c0_8 = arith.constant 0 : index
    %c0_9 = arith.constant 0 : index
    %16 = vector.load %arg5[%c0_7, %c0_8, %c0_9] : memref<1x128x128xbf16, #tpu.memory_space<vmem>>, vector<1x128x128xbf16>
    %17 = vector.shape_cast %16 : vector<1x128x128xbf16> to vector<128x128xbf16>
    %cst_10 = arith.constant dense<0.000000e+00> : vector<128x128xf32>
    %18 = tpu.matmul %15, %17, %cst_10 {dimension_numbers = #tpu.dot_dimension_numbers<[1], [0], [0], [1], [0, 0, 1, 1], [], []>} : vector<128x128xbf16>, vector<128x128xbf16>, vector<128x128xf32> -> vector<128x128xf32>
    %19 = tpu.iota {dimensions = array<i32: 1>} : vector<128x128xi32>
    %c16_i32 = arith.constant 16 : i32
    %20 = vector.broadcast %c16_i32 : i32 to vector<128x128xi32>
    %21 = arith.cmpi eq, %19, %20 : vector<128x128xi32>
    %cst_11 = arith.constant 0.000000e+00 : f32
    %22 = vector.broadcast %cst_11 : f32 to vector<128x128xf32>
    %23 = arith.select %21, %18, %22 : vector<128x128xi1>, vector<128x128xf32>
    %cst_12 = arith.constant dense<0.000000e+00> : vector<128xf32>
    %24 = vector.multi_reduction <add>, %23, %cst_12 [1] : vector<128x128xf32> to vector<128xf32>
    %25 = vector.shape_cast %24 : vector<128xf32> to vector<128x1xf32>
    %26 = tpu.reciprocal %25 {approx = true} : vector<128x1xf32> -> vector<128x1xf32>
    %27 = vector.broadcast %26 : vector<128x1xf32> to vector<128x128xf32>
    %28 = arith.mulf %14, %27 : vector<128x128xf32>
    %29 = arith.truncf %28 : vector<128x128xf32> to vector<128x128xbf16>
    %c0_13 = arith.constant 0 : index
    %c0_14 = arith.constant 0 : index
    %c0_15 = arith.constant 0 : index
    %30 = vector.load %arg8[%c0_13, %c0_14, %c0_15] : memref<1x128x128xbf16, #tpu.memory_space<vmem>>, vector<1x128x128xbf16>
    %31 = vector.shape_cast %30 : vector<1x128x128xbf16> to vector<128x128xbf16>
    %32 = vector.shape_cast %29 : vector<128x128xbf16> to vector<1x128x128xbf16>
    tpu.vector_store %arg8[%c0_13, %c0_14, %c0_15], %32 {strides = array<i32>} : memref<1x128x128xbf16, #tpu.memory_space<vmem>>, vector<1x128x128xbf16>,
    %c0_16 = arith.constant 0 : index
    %c0_17 = arith.constant 0 : index
    %33 = memref.load %arg6[%c0_16, %c0_17] : memref<1x1xf32, #tpu.memory_space<smem>>
    %34 = vector.broadcast %26 : vector<128x1xf32> to vector<128x128xf32>
    %35 = arith.mulf %18, %34 : vector<128x128xf32>
    %36 = vector.broadcast %33 : f32 to vector<128x128xf32>
    %37 = arith.mulf %36, %35 : vector<128x128xf32>
    %c0_18 = arith.constant 0 : index
    %c0_19 = arith.constant 0 : index
    %c0_20 = arith.constant 0 : index
    %38 = vector.load %arg2[%c0_18, %c0_19, %c0_20] : memref<1x128x128xf32, #tpu.memory_space<vmem>>, vector<1x128x128xf32>
    %39 = vector.shape_cast %38 : vector<1x128x128xf32> to vector<128x128xf32>
    %40 = arith.addf %37, %39 : vector<128x128xf32>
    %c0_21 = arith.constant 0 : index
    %c0_22 = arith.constant 0 : index
    %c0_23 = arith.constant 0 : index
    %41 = vector.load %arg7[%c0_21, %c0_22, %c0_23] : memref<1x128x128xf32, #tpu.memory_space<vmem>>, vector<1x128x128xf32>
    %42 = vector.shape_cast %41 : vector<1x128x128xf32> to vector<128x128xf32>
    %43 = vector.shape_cast %40 : vector<128x128xf32> to vector<1x128x128xf32>
    tpu.vector_store %arg7[%c0_21, %c0_22, %c0_23], %43 {strides = array<i32>} : memref<1x128x128xf32, #tpu.memory_space<vmem>>, vector<1x128x128xf32>,
    return
  }
  func.func @transform_0(%arg0: i32, %arg1: i32) -> (i32, i32, i32) {
    %c0_i32 = arith.constant 0 : i32
    %c0_i32_0 = arith.constant 0 : i32
    return %arg0, %arg1, %c0_i32 : i32, i32, i32
  }
  func.func @transform_1(%arg0: i32, %arg1: i32) -> (i32, i32, i32) {
    %c0_i32 = arith.constant 0 : i32
    %c0_i32_0 = arith.constant 0 : i32
    return %arg0, %arg1, %c0_i32 : i32, i32, i32
  }
  func.func @transform_2(%arg0: i32, %arg1: i32) -> (i32, i32, i32) {
    %c0_i32 = arith.constant 0 : i32
    %c0_i32_0 = arith.constant 0 : i32
    %c0_i32_1 = arith.constant 0 : i32
    return %arg0, %c0_i32, %c0_i32_0 : i32, i32, i32
  }
  func.func @transform_3(%arg0: i32, %arg1: i32) -> (i32, i32, i32) {
    %c0_i32 = arith.constant 0 : i32
    %c0_i32_0 = arith.constant 0 : i32
    %c0_i32_1 = arith.constant 0 : i32
    return %arg0, %c0_i32, %c0_i32_0 : i32, i32, i32
  }
  func.func @transform_4(%arg0: i32, %arg1: i32) -> (i32, i32) {
    %c0_i32 = arith.constant 0 : i32
    %c0_i32_0 = arith.constant 0 : i32
    %c0_i32_1 = arith.constant 0 : i32
    return %c0_i32, %c0_i32_0 : i32, i32
  }
  func.func @transform_5(%arg0: i32, %arg1: i32) -> (i32, i32, i32) {
    %c0_i32 = arith.constant 0 : i32
    %c0_i32_0 = arith.constant 0 : i32
    return %arg0, %arg1, %c0_i32 : i32, i32, i32
  }
  func.func @transform_6(%arg0: i32, %arg1: i32) -> (i32, i32, i32) {
    %c0_i32 = arith.constant 0 : i32
    %c0_i32_0 = arith.constant 0 : i32
    return %arg0, %arg1, %c0_i32 : i32, i32, i32
  }
}

</mosaic_0001>

<bundles_post_ra>
// kernel: tpu_custom_call.1
= control target key start
LH: loop header
LB: loop body
LE: loop exit
PB: predicated region body
PF: predicated region fallthrough
CT: control target
= control target key end

     0   :  { %s2698_s0 = inlined_call_operand.hbm [shape: f32[2,128,128], index: 0, kind: input, shape index: {}]   ;;  %s2699_s1 = inlined_call_operand.hbm [shape: bf16[2,128,128], index: 1, kind: input, shape index: {}]   ;;  %s2700_s2 = inlined_call_operand.hbm [shape: bf16[2,128,128], index: 2, kind: input, shape index: {}]   ;;  %s2701_s3 = inlined_call_operand.hbm [shape: bf16[2,128,128], index: 3, kind: input, shape index: {}]   ;;  %s2702_s4 = inlined_call_operand.<no memory space> [shape: f32[1,1], index: 4, kind: input, shape index: {}]   ;;  %s2703_s5 = inlined_call_operand.hbm [shape: f32[2,128,128], index: 5, kind: output, shape index: {0}]   ;;  %s2704_s6 = inlined_call_operand.hbm [shape: bf16[2,128,128], index: 6, kind: output, shape index: {1}]  }
   0x1   :  { %2713 = sst [smem:[#allocation24_spill]] %s2698_s0 }
   0x2   :  { %2714 = sst [smem:[#allocation25_spill]] %s2699_s1 }
   0x3   :  { %12 = sst [smem:[#allocation2]] %s2702_s4 }
   0x4   :  { %13 = vsyncpa [#allocation4], 0 }
   0x5   :  { %15 = vsyncpa [#allocation4 + $0x1], 0 }
   0x6   :  { %16 = vsyncpa [#allocation7], 0 }
   0x7   :  { %18 = vsyncpa [#allocation7 + $0x1], 0 }
   0x8   :  { %19 = vsyncpa [#allocation10], 0 }
   0x9   :  { %21 = vsyncpa [#allocation10 + $0x1], 0 }
   0xa   :  { %22 = vsyncpa [#allocation5], 0 }
   0xb   :  { %24 = vsyncpa [#allocation5 + $0x1], 0 }
   0xc   :  { %25 = vsyncpa [#allocation13], 0 }
   0xd   :  { %27 = vsyncpa [#allocation13 + $0x1], 0  ;;  %s2092_s23 = smov 0   ;;  %s2094_s24 = smov 0  }
   0xe   :  { %s2096_s25 = smov 0   ;;  %s2098_s26 = smov 0  }
   0xf   :  { %s2100_s27 = smov 0   ;;  %s2102_s4 = smov 0  }
  0x10 LB: > { %2715 = sst [smem:[#allocation19_spill]] %s2018_s23  ;;  %s2123_s28 = sadd.s32 4294967295, %s2038_s4   ;;  %s2038_s4 = sphi %s2102_s4, %s33_s4   ;;  %s2034_s27 = sphi %s2100_s27, %s2738_s27   ;;  %s2030_s26 = sphi %s2098_s26, %s2737_s26   ;;  %s2026_s25 = sphi %s2096_s25, %s2733_s25   ;;  %s2022_s24 = sphi %s2094_s24, %s2736_s24   ;;  %s2018_s23 = sphi %s2092_s23, %s2735_s23  }
  0x11   : > { %2716 = sst [smem:[#allocation20_spill]] %s2026_s25  ;;  %s1395_s29 = sadd.s32 4294967294, %s2038_s4  }
  0x12   : > { %s45_s30 = sadd.s32 1, %s2034_s27  ;;  %s54_s7 = sadd.s32 1, %s2026_s25 }
  0x13   : > { %p47_p0 = scmp.ge.s32.totalorder %s45_s30, 2  ;;  %p61_p1 = scmp.ne.s32.totalorder %s2026_s25, %s2022_s24 }
  0x14   : > { %p62_p2 = scmp.eq.s32.totalorder %s2038_s4, 0  ;;  %p67_p3 = scmp.ne.s32.totalorder %s2022_s24, %s2018_s23 }
  0x15   : > { %s2740_s30 = smov (%p47_p0, %s45_s30), 0  ;;  %p68_p5 = scmp.eq.s32.totalorder %s2123_s28, 0 }
  0x16   : > { %2717 = sst [smem:[#allocation21_spill]] %s2740_s30  ;;  %p2135_p4 = por %p62_p2, %p61_p1 }
  0x17   : > { %s49_s9 = ssub.s32 %s2034_s27, %s2740_s30  ;;  %p194_p6 = scmp.eq.s32.totalorder %s2123_s28, 1 }
  0x18   : > { %p52_p7 = scmp.eq.s32.totalorder %s49_s9, 0  ;;  %p2143_p8 = por %p68_p5, %p67_p3 }
  0x19   : > { %p2147_p9 = por %p194_p6, %p61_p1  ;;  %p200_p10 = scmp.eq.s32.totalorder %s1395_s29, 1 }
  0x1a   : > { %s2152_s12 = scalar_select %p52_p7, %s2026_s25, %s54_s7  }
  0x1b   : > { %p2154_p11 = por %p200_p10, %p67_p3  ;;  %p1397_p12 = scmp.ge.s32.totalorder %s2038_s4, 2 }
  0x1c   : > { %2721 = sst [smem:[#allocation22_spill]] %s2152_s12  ;;  %p1662_p13 = scmp.lt.s32.totalorder %s2038_s4, 2 }
  0x1d   : > { %s2722_s13 = scalar_select %p2154_p11, 1, 0 }
  0x1e   : > { %s2161_s14 = sand.u32 1, %s2026_s25   ;;  %s274_s15 = sand.u32 1, %s2038_s4  }
  0x1f   : > { %2723 = sst [smem:[#allocation23_spill]] %s2722_s13  ;;  %s2165_s16 = sshll.u32 %s2161_s14, 6 }
  0x20   : > { %p2169_p0 = pnand %p1662_p13, %p2135_p4  ;;  %s2174_s18 = sshll.u32 %s2034_s27, 10 }
  0x21   : > { %s2725_s1 = sld [smem:[#allocation25_spill]]  ;;  %s278_s22 = scalar_lea.vmem [#allocation6], %s2165_s16 }
  0x22   : > { %s287_s29 = sshll.u32 %s278_s22, 4  ;;  %s2181_s7 = scalar_lea.sflag [#allocation7], %s274_s15  ;;  %s288_s29 = int_to_ptr.vmem [resolvable:$true] %s287_s29 }
  0x23   : > { %p1810_p1 = pneg %p2169_p0  ;;  %s1821_s8 = scalar_lea.vmem %s288_s29, 1024 }
  0x24   : > { %p1822_p2 = scmp.ne.s32.totalorder %s288_s29, %s1821_s8  ;;  %s2040_s9 = smov [#allocation6]  }
  0x25   : > { %s1826_s30 = sshll.u32 %s2040_s9, 4  ;;  %s1827_s30 = int_to_ptr.vmem [resolvable:$false] %s1826_s30 }
  0x26   : > { %p1824_p3 = pnand %p1822_p2, %p1810_p1  ;;  %s1828_s12 = scalar_lea.vmem %s1827_s30, 2048 }
  0x27   : > { %s286_s21 = scalar_lea.hbm %s2725_s1, %s2174_s18  ;;  %p1829_p5 = scmp.lt.s32.totalorder %s288_s29, %s1827_s30 }
  0x28   : > { %p1825_p4 = pneg %p1824_p3  ;;  %p1830_p6 = scmp.lt.s32.totalorder %s1828_s12, %s1821_s8 }
  0x2a   : > { %p1831_p7 = por %p1830_p6, %p1829_p5 }
  0x2c   : > { %p1832_p10 = pnand %p1831_p7, %p1825_p4 }
  0x2e   : > { %1835 = shalt.err (!%p1832_p10)
}
  0x2f   : > { %s2709_s19 = smov 64   ;;  %s2711_s15 = smov 4  }
  0x30   : > { %1648 = dma.hbm_to_vmem [thread:$0]  (!%p2169_p0), %s286_s21, 1024, %s288_s29, %s2181_s7, %s2709_s19, %s2709_s19, %s2711_s15  }
  0x31   : > { %p1410_p13 = scmp.ge.s32.totalorder %s2038_s4, 1  ;;  %p337_p2 = scmp.lt.s32.totalorder %s2038_s4, 3 }
  0x32   : > { %s1398_s12 = sshll.u32 %s2161_s14, 7  ;;  %s1465_s20 = sshll.u32 %s2034_s27, 11 }
  0x33   : > { %p2196_p3 = pnand %p1410_p13, %p337_p2  ;;  %s2727_s0 = sld [smem:[#allocation24_spill]] }
  0x34   : > { %s255_s1 = scalar_lea.vmem [#allocation3], %s1398_s12  ;;  %s252_s13 = scalar_lea.sflag [#allocation4], %s2161_s14 }
  0x35   : > { %s264_s25 = sshll.u32 %s255_s1, 4  ;;  %s2043_s21 = smov [#allocation3]   ;;  %s265_s25 = int_to_ptr.vmem [resolvable:$true] %s264_s25 }
  0x36   : > { %s1849_s23 = scalar_lea.vmem %s265_s25, 2048  ;;  %s1854_s29 = sshll.u32 %s2043_s21, 4  ;;  %s1855_s29 = int_to_ptr.vmem [resolvable:$false] %s1854_s29 }
  0x37   : > { %p1850_p4 = scmp.ne.s32.totalorder %s265_s25, %s1849_s23  ;;  %s1856_s19 = scalar_lea.vmem %s1855_s29, 4096 }
  0x38   : > { %p1857_p7 = scmp.lt.s32.totalorder %s265_s25, %s1855_s29  ;;  %p1858_p10 = scmp.lt.s32.totalorder %s1856_s19, %s1849_s23 }
  0x39   : > { %s263_s9 = scalar_lea.hbm %s2727_s0, %s1465_s20  ;;  %p1852_p5 = pnand %p1850_p4, %p1810_p1 }
  0x3a   : > { %p1859_p13 = por %p1858_p10, %p1857_p7 }
  0x3b   : > { %p1853_p6 = pneg %p1852_p5 }
  0x3d   : > { %p1860_p2 = pnand %p1859_p13, %p1853_p6 }
  0x3f   : > { %1863 = shalt.err (!%p1860_p2)
}
  0x40   : > { %s2044_s20 = smov 128   ;;  %s2045_s1 = smov 8  }
  0x41   : > { %1645 = dma.hbm_to_vmem [thread:$0]  (!%p2169_p0), %s263_s9, 2048, %s265_s25, %s252_s13, %s2044_s20, %s2044_s20, %s2045_s1  }
  0x42   : > { %s307_s8 = scalar_lea.hbm %s2700_s2, %s2174_s18  ;;  %s301_s21 = scalar_lea.vmem [#allocation8], %s2165_s16 }
  0x43   : > { %s308_s15 = sshll.u32 %s301_s21, 4  ;;  %s2046_s23 = smov [#allocation8]   ;;  %s309_s15 = int_to_ptr.vmem [resolvable:$true] %s308_s15 }
  0x44   : > { %s1877_s29 = scalar_lea.vmem %s309_s15, 1024  ;;  %s1882_s19 = sshll.u32 %s2046_s23, 4  ;;  %s1883_s19 = int_to_ptr.vmem [resolvable:$false] %s1882_s19 }
  0x45   : > { %p1878_p4 = scmp.ne.s32.totalorder %s309_s15, %s1877_s29  ;;  %s1884_s0 = scalar_lea.vmem %s1883_s19, 2048 }
  0x46   : > { %p1885_p7 = scmp.lt.s32.totalorder %s309_s15, %s1883_s19  ;;  %p1886_p10 = scmp.lt.s32.totalorder %s1884_s0, %s1877_s29 }
  0x47   : > { %p1880_p5 = pnand %p1878_p4, %p1810_p1 }
  0x48   : > { %p1887_p13 = por %p1886_p10, %p1885_p7 }
  0x49   : > { %p1881_p6 = pneg %p1880_p5 }
  0x4b   : > { %p1888_p2 = pnand %p1887_p13, %p1881_p6 }
  0x4d   : > { %1891 = shalt.err (!%p1888_p2)
}
  0x4e   : > { %s2728_s25 = smov 4   ;;  %s2729_s13 = smov 64  }
  0x4f   : > { %1651 = dma.hbm_to_vmem [thread:$0]  (!%p2169_p0), %s307_s8, 1024, %s309_s15, %s2181_s7, %s2729_s13, %s2729_s13, %s2728_s25  }
  0x50   : > { %s328_s1 = scalar_lea.hbm %s2701_s3, %s2174_s18  ;;  %s322_s12 = scalar_lea.vmem [#allocation9], %s2165_s16 }
  0x51   : > { %s329_s0 = sshll.u32 %s322_s12, 4  ;;  %s319_s22 = scalar_lea.sflag [#allocation10], %s2161_s14  ;;  %s330_s0 = int_to_ptr.vmem [resolvable:$true] %s329_s0 }
  0x52   : > { %s1905_s21 = scalar_lea.vmem %s330_s0, 1024  ;;  %s2047_s29 = smov [#allocation9]  }
  0x53   : > { %p1906_p4 = scmp.ne.s32.totalorder %s330_s0, %s1905_s21  ;;  %s1910_s23 = sshll.u32 %s2047_s29, 4  ;;  %s1911_s23 = int_to_ptr.vmem [resolvable:$false] %s1910_s23 }
  0x54   : > { %s1912_s19 = scalar_lea.vmem %s1911_s23, 2048  ;;  %p1913_p7 = scmp.lt.s32.totalorder %s330_s0, %s1911_s23 }
  0x55   : > { %p1908_p5 = pnand %p1906_p4, %p1810_p1  ;;  %p1914_p10 = scmp.lt.s32.totalorder %s1912_s19, %s1905_s21 }
  0x57   : > { %p1909_p6 = pneg %p1908_p5  ;;  %p1915_p13 = por %p1914_p10, %p1913_p7 }
  0x59   : > { %p1916_p2 = pnand %p1915_p13, %p1909_p6 }
  0x5b   : > { %1919 = shalt.err (!%p1916_p2)
}
  0x5c   : > { %1654 = dma.hbm_to_vmem [thread:$0]  (!%p2169_p0), %s328_s1, 1024, %s330_s0, %s319_s22, %s2729_s13, %s2729_s13, %s2728_s25  }
  0x5d   : > { %341 = sbr.rel (%p2196_p3) target bundleno = 922 (0x39a), region = 40  ;;  %s2242_s14 = sand.u32 (!%p2196_p3), 1, %s2022_s24  }
  0x5e   : > { %s1411_s16 = sshll.u32 (!%p2196_p3), %s2242_s14, 7  ;;  %s344_s18 = scalar_lea.sflag (!%p2196_p3), [#allocation4], %s2242_s14 }
  0x5f   : > { %s2248_s7 = scalar_lea.vmem (!%p2196_p3), [#allocation3], %s1411_s16 }
  0x62   : > { %1997 = dma.done.wait (%p2143_p8), %s344_s18, 2048  }
  0x63   : > { %1999 = vsyncadd (%p2143_p8), %s344_s18, 4294965248  ;;  %s352_s17 = sand.u32 1, %s2123_s28   ;;  %s2256_s15 = sshll.u32 %s2242_s14, 6 }
  0x64   : > { %s353_s30 = scalar_lea.sflag [#allocation7], %s352_s17  ;;  %s2259_s8 = scalar_lea.vmem [#allocation6], %s2256_s15 }
  0x65   : > { %2001 = dma.done.wait (%p2143_p8), %s353_s30, 2048  }
  0x66   : > { %2003 = vsyncadd (%p2143_p8), %s353_s30, 4294965248  ;;  %s365_s25 = scalar_lea.vmem [#allocation8], %s2256_s15  ;;  %s371_s13 = scalar_lea.sflag [#allocation10], %s2242_s14 }
  0x67   : > { %s2268_s9 = scalar_lea.vmem [#allocation9], %s2256_s15 }
  0x68   : > { %2005 = dma.done.wait (%p2143_p8), %s371_s13, 1024  }
  0x69   : > { %2007 = vsyncadd (%p2143_p8), %s371_s13, 4294966272  ;;  %v1720_v0 = vld [vmem:[%s365_s25 + $0x38] sm:$0xff]   ;;  %v1721_v1 = vld [vmem:[%s365_s25 + $0x30] sm:$0xff]   ;;  %v653_v18 = vlaneseq  ;;  %s1082_s28 = sld [smem:[#allocation2]]  ;;  %s2526_s10 = scalar_lea.vmem [#allocation11], %s1411_s16 }
  0x6a   : > { %1566 = vmatprep.subr.bf16.mxu0 %v1720_v0  ;;  %v1722_v2 = vld [vmem:[%s365_s25 + $0x28] sm:$0xff]   ;;  %v1723_v3 = vld [vmem:[%s365_s25 + $0x20] sm:$0xff]   ;;  %v1724_v5 = vld [vmem:[%s365_s25 + $0x18] sm:$0xff]   ;;  %s2536_s20 = scalar_lea.vmem [#allocation12], %s2256_s15  ;;  %s1486_s1 = sshll.u32 %s2030_s26, 10 }
  0x6b   : > { %1567 = vmatpush3.bf16.msra.mxu0 %v1720_v0  ;;  %v1728_v4 = vld [vmem:[%s2259_s8] sm:$0xff]   ;;  %v1725_v6 = vld [vmem:[%s365_s25 + $0x10] sm:$0xff]   ;;  %v1726_v7 = vld [vmem:[%s365_s25 + $0x8] sm:$0xff]   ;;  %v2284_v19 = vand.u32 127, %v653_v18  ;;  %s1203_s12 = sshll.u32 %s2536_s20, 4  ;;  %s1485_s0 = sshll.u32 %s2030_s26, 11  ;;  %s2615_s12 = int_to_ptr.vmem [resolvable:$true] %s1203_s12 }
  0x6c   : > { %1568 = vmatprep.subr.bf16.mxu0 %v1721_v1  ;;  %1582 = vmatprep.mubr.bf16.mxu0 %v1728_v4  ;;  %v1727_v8 = vld [vmem:[%s365_s25] sm:$0xff]   ;;  %v1729_v9 = vld [vmem:[%s2259_s8 + $0x8] sm:$0xff]   ;;  %v1730_v10 = vld [vmem:[%s2259_s8 + $0x10] sm:$0xff]   ;;  %s1185_s22 = sshll.u32 %s2526_s10, 4  ;;  %s2613_s23 = scalar_lea.hbm %s2704_s6, %s1486_s1  ;;  %s2625_s22 = int_to_ptr.vmem [resolvable:$true] %s1185_s22 }
  0x6d   : > { %v1731_v11 = vld [vmem:[%s2259_s8 + $0x18] sm:$0xff]   ;;  %v1732_v12 = vld [vmem:[%s2259_s8 + $0x20] sm:$0xff]   ;;  %v1733_v13 = vld [vmem:[%s2259_s8 + $0x28] sm:$0xff]   ;;  %vm655_vm0 = vcmp.lt.s32.totalorder %v2284_v19, 64  ;;  %vm921_vm1 = vcmp.eq.s32.totalorder %v2284_v19, 16  ;;  %s2623_s16 = scalar_lea.hbm %s2703_s5, %s1485_s0  ;;  %s1170_s18 = scalar_lea.sflag [#allocation13], %s2242_s14 }
  0x6e   : > { %v1734_v14 = vld [vmem:[%s2259_s8 + $0x30] sm:$0xff]   ;;  %v1735_v15 = vld [vmem:[%s2259_s8 + $0x38] sm:$0xff]   ;;  %v1738_v32 = vld [vmem:[%s2268_s9 + $0x28] sm:$0xff]   ;;  %s2048_s17 = smov [#allocation12]  }
  0x6f   : > { %1569 = vmatpush3.bf16.msra.mxu0 %v1721_v1  ;;  %v1736_v16 = vld [vmem:[%s2268_s9 + $0x38] sm:$0xff]   ;;  %v1737_v17 = vld [vmem:[%s2268_s9 + $0x30] sm:$0xff]   ;;  %v1739_v37 = vld [vmem:[%s2268_s9 + $0x20] sm:$0xff]   ;;  %s1924_s15 = sshll.u32 %s2048_s17, 4  ;;  %s1925_s15 = int_to_ptr.vmem [resolvable:$false] %s1924_s15 }
  0x70   : > { %1570 = vmatprep.subr.bf16.mxu0 %v1722_v2  ;;  %1598 = vmatprep.subr.bf16.mxu1 %v1736_v16  ;;  %v1740_v42 = vld [vmem:[%s2268_s9 + $0x18] sm:$0xff]   ;;  %v1741_v48 = vld [vmem:[%s2268_s9 + $0x10] sm:$0xff]   ;;  %v1742_v53 = vld [vmem:[%s2268_s9 + $0x8] sm:$0xff]   ;;  %s1926_s30 = scalar_lea.vmem %s1925_s15, 2048  ;;  %p1927_p3 = scmp.lt.s32.totalorder %s2615_s12, %s1925_s15 }
  0x71   : > { %1599 = vmatpush3.bf16.msra.mxu1 %v1736_v16  ;;  %v1743_v56 = vld [vmem:[%s2268_s9] sm:$0xff]  }
  0x72   : > { %1600 = vmatprep.subr.bf16.mxu1 %v1737_v17 }
  0x73   : > { %1571 = vmatpush3.bf16.msra.mxu0 %v1722_v2 }
  0x74   : > { %1572 = vmatprep.subr.bf16.mxu0 %v1723_v3 }
  0x75   : > { %1601 = vmatpush3.bf16.msra.mxu1 %v1737_v17 }
  0x76   : > { %1602 = vmatprep.subr.bf16.mxu1 %v1738_v32 }
  0x77   : > { %1573 = vmatpush3.bf16.msra.mxu0 %v1723_v3 }
  0x78   : > { %1574 = vmatprep.subr.bf16.mxu0 %v1724_v5 }
  0x79   : > { %1603 = vmatpush3.bf16.msra.mxu1 %v1738_v32 }
  0x7a   : > { %1604 = vmatprep.subr.bf16.mxu1 %v1739_v37 }
  0x7b   : > { %1575 = vmatpush3.bf16.msra.mxu0 %v1724_v5 }
  0x7c   : > { %1576 = vmatprep.subr.bf16.mxu0 %v1725_v6 }
  0x7d   : > { %1605 = vmatpush3.bf16.msra.mxu1 %v1739_v37 }
  0x7e   : > { %1606 = vmatprep.subr.bf16.mxu1 %v1740_v42 }
  0x7f   : > { %1577 = vmatpush3.bf16.msra.mxu0 %v1725_v6 }
  0x80   : > { %1578 = vmatprep.subr.bf16.mxu0 %v1726_v7 }
  0x81   : > { %1607 = vmatpush3.bf16.msra.mxu1 %v1740_v42 }
  0x82   : > { %1608 = vmatprep.subr.bf16.mxu1 %v1741_v48 }
  0x83   : > { %1579 = vmatpush3.bf16.msra.mxu0 %v1726_v7 }
  0x84   : > { %1580 = vmatprep.subr.bf16.mxu0 %v1727_v8 }
  0x85   : > { %1609 = vmatpush3.bf16.msra.mxu1 %v1741_v48 }
  0x86   : > { %1610 = vmatprep.subr.bf16.mxu1 %v1742_v53 }
  0x87   : > { %1581 = vmatpush3.bf16.msra.mxu0 %v1727_v8 }
  0x89   : > { %1611 = vmatpush3.bf16.msra.mxu1 %v1742_v53 }
  0x8a   : > { %1583 = vmatmul.mubr.bf16.vlgmr.msra.gmra.mxu0 %v1729_v9  ;;  %1612 = vmatprep.subr.bf16.mxu1 %v1743_v56 }
  0x8b   : > { %1586 = vmatprep.mubr.bf16.mxu0 %v1730_v10 }
  0x8d   : > { %1613 = vmatpush3.bf16.msra.mxu1 %v1743_v56 }
  0x92   : > { %1587 = vmatmul.mubr.bf16.gmra.mxu0 %v1731_v11 }
  0x93   : > { %1590 = vmatprep.mubr.bf16.mxu0 %v1732_v12 }
  0x9a   : > { %1591 = vmatmul.mubr.bf16.gmra.mxu0 %v1733_v13 }
  0x9b   : > { %1594 = vmatprep.mubr.bf16.mxu0 %v1734_v14 }
  0xa2   : > { %1595 = vmatmul.mubr.bf16.gmra.mxu0 %v1735_v15 }
 0x14a   : > { %v1584_v20 = vpop.f32.mrf.mxu0 }
 0x14b   : > { %v2289_v21 = vsel %vm655_vm0, %v1584_v20, -1e+30 }
 0x14c   : > { %676 = vmax.xlane.f32.xlu1 %v2289_v21  ;;  %v590_v22 = vpop.f32.mrf.mxu0 }
 0x14d   : > { %v2294_v23 = vsel %vm655_vm0, %v590_v22, -1e+30 }
 0x14e   : > { %672 = vmax.xlane.f32.xlu0 %v2294_v23  ;;  %v1585_v24 = vpop.f32.mrf.mxu0 }
 0x14f   : > { %v2299_v25 = vsel %vm655_vm0, %v1585_v24, -1e+30 }
 0x150   : > { %678 = vmax.xlane.f32.xlu1 %v2299_v25  ;;  %v593_v26 = vpop.f32.mrf.mxu0 }
 0x151   : > { %v2304_v27 = vsel %vm655_vm0, %v593_v26, -1e+30 }
 0x152   : > { %674 = vmax.xlane.f32.xlu0 %v2304_v27  ;;  %v1588_v28 = vpop.f32.mrf.mxu0 }
 0x153   : > { %v2315_v34 = vsel %vm655_vm0, %v1588_v28, -1e+30 }
 0x154   : > { %v606_v29 = vpop.f32.mrf.mxu0 }
 0x155   : > { %v2309_v30 = vsel %vm655_vm0, %v606_v29, -1e+30 }
 0x156   : > { %680 = vmax.xlane.f32.xlu0 %v2309_v30  ;;  %v1589_v31 = vpop.f32.mrf.mxu0 }
 0x157   : > { %v2326_v39 = vsel %vm655_vm0, %v1589_v31, -1e+30 }
 0x158   : > { %v609_v33 = vpop.f32.mrf.mxu0 }
 0x159   : > { %v2319_v35 = vsel %vm655_vm0, %v609_v33, -1e+30 }
 0x15a   : > { %684 = vmax.xlane.f32.xlu0 %v2315_v34  ;;  %682 = vmax.xlane.f32.xlu1 %v2319_v35  ;;  %v1592_v36 = vpop.f32.mrf.mxu0 }
 0x15b   : > { %v2337_v44 = vsel %vm655_vm0, %v1592_v36, -1e+30 }
 0x15c   : > { %v622_v38 = vpop.f32.mrf.mxu0 }
 0x15d   : > { %v2330_v40 = vsel %vm655_vm0, %v622_v38, -1e+30 }
 0x15e   : > { %686 = vmax.xlane.f32.xlu1 %v2326_v39  ;;  %688 = vmax.xlane.f32.xlu0 %v2330_v40  ;;  %v1593_v41 = vpop.f32.mrf.mxu0 }
 0x15f   : > { %v2348_v49 = vsel %vm655_vm0, %v1593_v41, -1e+30 }
 0x160   : > { %v625_v43 = vpop.f32.mrf.mxu0 }
 0x161   : > { %v2341_v45 = vsel %vm655_vm0, %v625_v43, -1e+30 }
 0x162   : > { %692 = vmax.xlane.f32.xlu0 %v2337_v44  ;;  %690 = vmax.xlane.f32.xlu1 %v2341_v45  ;;  %v1596_v46 = vpop.f32.mrf.mxu0 }
 0x163   : > { %v2359_v54 = vsel %vm655_vm0, %v1596_v46, -1e+30 }
 0x164   : > { %v638_v47 = vpop.f32.mrf.mxu0 }
 0x165   : > { %v2352_v50 = vsel %vm655_vm0, %v638_v47, -1e+30 }
 0x166   : > { %694 = vmax.xlane.f32.xlu1 %v2348_v49  ;;  %696 = vmax.xlane.f32.xlu0 %v2352_v50  ;;  %v1597_v51 = vpop.f32.mrf.mxu0 }
 0x167   : > { %v2370_v57 = vsel %vm655_vm0, %v1597_v51, -1e+30 }
 0x168   : > { %v641_v52 = vpop.f32.mrf.mxu0 }
 0x169   : > { %v2363_v55 = vsel %vm655_vm0, %v641_v52, -1e+30 }
 0x16a   : > { %700 = vmax.xlane.f32.xlu0 %v2359_v54  ;;  %698 = vmax.xlane.f32.xlu1 %v2363_v55 }
 0x16e   : > { %702 = vmax.xlane.f32.xlu1 %v2370_v57 }
 0x1d5   : > { %v677_v58 = vpop.xlane.xlu1 %676 }
 0x1d6   : > { %v706_v61 = vsub.f32 %v2289_v21, %v677_v58 }
 0x1d7   : > { %v673_v59 = vpop.xlane.xlu0 %672 }
 0x1d8   : > { %v704_v60 = vsub.f32 %v2294_v23, %v673_v59  ;;  %v724_v4 = vmul.f32 1.442695, %v706_v61 }
 0x1d9   : > { %v679_v62 = vpop.xlane.xlu1 %678 }
 0x1da   : > { %v720_v63 = vmul.f32 1.442695, %v704_v60  ;;  %v707_v0 = vsub.f32 %v2299_v25, %v679_v62 }
 0x1db   : > { %v675_v1 = vpop.xlane.xlu0 %674 }
 0x1dc   : > { %v726_v2 = vmul.f32 1.442695, %v707_v0  ;;  %v705_v3 = vsub.f32 %v2304_v27, %v675_v1  ;;  %1744 = vpow2.f32 %v720_v63 }
 0x1de   : > { %v722_v5 = vmul.f32 1.442695, %v705_v3  ;;  %1746 = vpow2.f32 %v726_v2 }
 0x1df   : > { %v681_v6 = vpop.xlane.xlu0 %680 }
 0x1e0   : > { %1748 = vpow2.f32 %v722_v5  ;;  %v708_v7 = vsub.f32 %v2309_v30, %v681_v6 }
 0x1e1   : > { %1750 = vpow2.f32 %v724_v4 }
 0x1e2   : > { %v728_v10 = vmul.f32 1.442695, %v708_v7 }
 0x1e3   : > { %v685_v8 = vpop.xlane.xlu0 %684  ;;  %v683_v9 = vpop.xlane.xlu1 %682 }
 0x1e4   : > { %v710_v11 = vsub.f32 %v2315_v34, %v685_v8  ;;  %v709_v12 = vsub.f32 %v2319_v35, %v683_v9  ;;  %1752 = vpow2.f32 %v728_v10 }
 0x1e6   : > { %v730_v13 = vmul.f32 1.442695, %v709_v12  ;;  %v732_v14 = vmul.f32 1.442695, %v710_v11 }
 0x1e7   : > { %v687_v15 = vpop.xlane.xlu1 %686  ;;  %v689_v16 = vpop.xlane.xlu0 %688 }
 0x1e8   : > { %v711_v17 = vsub.f32 %v2326_v39, %v687_v15  ;;  %v712_v18 = vsub.f32 %v2330_v40, %v689_v16  ;;  %1754 = vpow2.f32 %v730_v13 }
 0x1e9   : > { %v2382_v21 = vpop.eup %1744  ;;  %1756 = vpow2.f32 %v732_v14 }
 0x1ea   : > { %v734_v20 = vmul.f32 1.442695, %v711_v17  ;;  %v736_v25 = vmul.f32 1.442695, %v712_v18 }
 0x1eb   : > { %v693_v22 = vpop.xlane.xlu0 %692  ;;  %v691_v23 = vpop.xlane.xlu1 %690 }
 0x1ec   : > { %v2384_v24 = vpop.eup %1746  ;;  %1758 = vpow2.f32 %v734_v20  ;;  %v714_v26 = vsub.f32 %v2337_v44, %v693_v22  ;;  %v713_v27 = vsub.f32 %v2341_v45, %v691_v23 }
 0x1ed   : > { %v2388_v28 = vpop.eup %1748  ;;  %1760 = vpow2.f32 %v736_v25 }
 0x1ee   : > { %v2390_v29 = vpop.eup %1750  ;;  %v738_v30 = vmul.f32 1.442695, %v713_v27  ;;  %v752_v31 = vpack.c.bf16 %v2388_v28, %v2382_v21  ;;  %v740_v32 = vmul.f32 1.442695, %v714_v26 }
 0x1ef   : > { %v695_v33 = vpop.xlane.xlu1 %694  ;;  %v697_v34 = vpop.xlane.xlu0 %696  ;;  %v753_v35 = vpack.c.bf16 %v2384_v24, %v2390_v29 }
 0x1f0   : > { %v715_v36 = vsub.f32 %v2348_v49, %v695_v33  ;;  %v716_v37 = vsub.f32 %v2352_v50, %v697_v34  ;;  %1614 = vmatprep.mubr.bf16.mxu1 %v752_v31  ;;  %1762 = vpow2.f32 %v738_v30 }
 0x1f1   : > { %1615 = vmatmul.mubr.bf16.vlgmr.msra.gmra.mxu1 %v753_v35  ;;  %1764 = vpow2.f32 %v740_v32  ;;  %v2400_v44 = vpop.eup %1752 }
 0x1f2   : > { %v742_v38 = vmul.f32 1.442695, %v715_v36  ;;  %v744_v41 = vmul.f32 1.442695, %v716_v37 }
 0x1f3   : > { %v701_v39 = vpop.xlane.xlu0 %700  ;;  %v699_v40 = vpop.xlane.xlu1 %698 }
 0x1f4   : > { %1766 = vpow2.f32 %v742_v38  ;;  %v718_v42 = vsub.f32 %v2359_v54, %v701_v39  ;;  %v717_v43 = vsub.f32 %v2363_v55, %v699_v40 }
 0x1f5   : > { %v2402_v45 = vpop.eup %1754  ;;  %1768 = vpow2.f32 %v744_v41 }
 0x1f6   : > { %v746_v46 = vmul.f32 1.442695, %v717_v43  ;;  %v748_v47 = vmul.f32 1.442695, %v718_v42  ;;  %v754_v49 = vpack.c.bf16 %v2402_v45, %v2400_v44  ;;  %v2406_v50 = vpop.eup %1756 }
 0x1f7   : > { %v703_v48 = vpop.xlane.xlu1 %702 }
 0x1f8   : > { %v719_v51 = vsub.f32 %v2370_v57, %v703_v48  ;;  %1770 = vpow2.f32 %v746_v46  ;;  %1618 = vmatprep.mubr.bf16.mxu1 %v754_v49  ;;  %v2515_v48 = vstv %s1082_s28 }
 0x1f9   : > { %v2409_v52 = vpop.eup %1758  ;;  %1772 = vpow2.f32 %v748_v47 }
 0x1fa   : > { %v750_v53 = vmul.f32 1.442695, %v719_v51  ;;  %v755_v54 = vpack.c.bf16 %v2409_v52, %v2406_v50  ;;  %v2413_v55 = vpop.eup %1760 }
 0x1fc   : > { %1774 = vpow2.f32 %v750_v53  ;;  %1619 = vmatmul.mubr.bf16.gmra.mxu1 %v755_v54  ;;  %v1118_v53 = vld [vmem:[%s2248_s7 + $0x10] sm:$0xff] }
 0x1fd   : > { %v2415_v56 = vpop.eup %1762 }
 0x1fe   : > { %v756_v58 = vpack.c.bf16 %v2415_v56, %v2413_v55  ;;  %v2419_v59 = vpop.eup %1764 }
 0x200   : > { %1622 = vmatprep.mubr.bf16.mxu1 %v756_v58 }
 0x201   : > { %v2421_v57 = vpop.eup %1766 }
 0x202   : > { %v757_v60 = vpack.c.bf16 %v2421_v57, %v2419_v59  ;;  %v2425_v61 = vpop.eup %1768 }
 0x204   : > { %1623 = vmatmul.mubr.bf16.gmra.mxu1 %v757_v60 }
 0x205   : > { %v2427_v62 = vpop.eup %1770 }
 0x206   : > { %v758_v63 = vpack.c.bf16 %v2427_v62, %v2425_v61  ;;  %v2431_v0 = vpop.eup %1772 }
 0x208   : > { %1626 = vmatprep.mubr.bf16.mxu1 %v758_v63 }
 0x209   : > { %v2433_v1 = vpop.eup %1774 }
 0x20a   : > { %v759_v2 = vpack.c.bf16 %v2433_v1, %v2431_v0 }
 0x20c   : > { %1627 = vmatmul.mubr.bf16.gmra.mxu1 %v759_v2 }
 0x2b1   : > { %v1616_v3 = vpop.f32.mrf.mxu1 }
 0x2b2   : > { %v924_v4 = vsel %vm921_vm1, %v1616_v3, 0.0 }
 0x2b3   : > { %v2440_v5 = vpop.f32.mrf.mxu1  ;;  %942 = vadd.xlane.f32.xlu0 %v924_v4 }
 0x2b4   : > { %v922_v7 = vsel %vm921_vm1, %v2440_v5, 0.0 }
 0x2b5   : > { %v2442_v6 = vpop.f32.mrf.mxu1 }
 0x2b6   : > { %v925_v8 = vsel %vm921_vm1, %v2442_v6, 0.0 }
 0x2b7   : > { %v2450_v9 = vpop.f32.mrf.mxu1  ;;  %938 = vadd.xlane.f32.xlu0 %v922_v7  ;;  %944 = vadd.xlane.f32.xlu1 %v925_v8 }
 0x2b8   : > { %v923_v10 = vsel %vm921_vm1, %v2450_v9, 0.0 }
 0x2bb   : > { %940 = vadd.xlane.f32.xlu1 %v923_v10  ;;  %v1116_v10 = vld [vmem:[%s2248_s7] sm:$0xff] }
 0x2bc   : > { %v2455_v11 = vpop.f32.mrf.mxu1 }
 0x2bd   : > { %v928_v12 = vsel %vm921_vm1, %v2455_v11, 0.0 }
 0x2be   : > { %v2460_v13 = vpop.f32.mrf.mxu1  ;;  %950 = vadd.xlane.f32.xlu0 %v928_v12 }
 0x2bf   : > { %v926_v15 = vsel %vm921_vm1, %v2460_v13, 0.0 }
 0x2c0   : > { %v2462_v14 = vpop.f32.mrf.mxu1 }
 0x2c1   : > { %v929_v16 = vsel %vm921_vm1, %v2462_v14, 0.0 }
 0x2c2   : > { %v2470_v17 = vpop.f32.mrf.mxu1  ;;  %946 = vadd.xlane.f32.xlu0 %v926_v15  ;;  %952 = vadd.xlane.f32.xlu1 %v929_v16 }
 0x2c3   : > { %v927_v22 = vsel %vm921_vm1, %v2470_v17, 0.0 }
 0x2c4   : > { %v2472_v18 = vpop.f32.mrf.mxu1 }
 0x2c5   : > { %v932_v20 = vsel %vm921_vm1, %v2472_v18, 0.0 }
 0x2c6   : > { %v2480_v23 = vpop.f32.mrf.mxu1  ;;  %958 = vadd.xlane.f32.xlu0 %v932_v20  ;;  %948 = vadd.xlane.f32.xlu1 %v927_v22 }
 0x2c7   : > { %v930_v26 = vsel %vm921_vm1, %v2480_v23, 0.0 }
 0x2c8   : > { %v2482_v25 = vpop.f32.mrf.mxu1 }
 0x2c9   : > { %v933_v27 = vsel %vm921_vm1, %v2482_v25, 0.0 }
 0x2ca   : > { %v2490_v30 = vpop.f32.mrf.mxu1  ;;  %954 = vadd.xlane.f32.xlu0 %v930_v26  ;;  %960 = vadd.xlane.f32.xlu1 %v933_v27 }
 0x2cb   : > { %v931_v32 = vsel %vm921_vm1, %v2490_v30, 0.0 }
 0x2cc   : > { %v2492_v31 = vpop.f32.mrf.mxu1 }
 0x2cd   : > { %v936_v37 = vsel %vm921_vm1, %v2492_v31, 0.0 }
 0x2ce   : > { %956 = vadd.xlane.f32.xlu1 %v931_v32  ;;  %v2497_v33 = vpop.f32.mrf.mxu1 }
 0x2cf   : > { %v934_v34 = vsel %vm921_vm1, %v2497_v33, 0.0 }
 0x2d0   : > { %962 = vadd.xlane.f32.xlu0 %v934_v34  ;;  %v2502_v35 = vpop.f32.mrf.mxu1 }
 0x2d1   : > { %v937_v39 = vsel %vm921_vm1, %v2502_v35, 0.0 }
 0x2d2   : > { %v2504_v36 = vpop.f32.mrf.mxu1 }
 0x2d3   : > { %v935_v38 = vsel %vm921_vm1, %v2504_v36, 0.0 }
 0x2d4   : > { %966 = vadd.xlane.f32.xlu0 %v936_v37  ;;  %964 = vadd.xlane.f32.xlu1 %v935_v38  ;;  %v1117_v37 = vld [vmem:[%s2248_s7 + $0x8] sm:$0xff] }
 0x2d8   : > { %968 = vadd.xlane.f32.xlu1 %v937_v39 }
 0x33c   : > { %v943_v40 = vpop.xlane.xlu0 %942 }
 0x33d   : > { %1776 = vrcp.f32 %v943_v40  ;;  %v1122_v40 = vld [vmem:[%s2248_s7 + $0x30] sm:$0xff] }
 0x340   : > { %v939_v41 = vpop.xlane.xlu0 %938  ;;  %v945_v42 = vpop.xlane.xlu1 %944 }
 0x341   : > { %1778 = vrcp.f32 %v939_v41 }
 0x342   : > { %1780 = vrcp.f32 %v945_v42 }
 0x344   : > { %v941_v43 = vpop.xlane.xlu1 %940 }
 0x345   : > { %1782 = vrcp.f32 %v941_v43 }
 0x347   : > { %v951_v46 = vpop.xlane.xlu0 %950 }
 0x348   : > { %1784 = vrcp.f32 %v951_v46 }
 0x34a   : > { %v1777_v47 = vpop.eup %1776 }
 0x34b   : > { %v1085_v49 = vmul.f32 %v1777_v47, %v1616_v3  ;;  %v947_v19 = vpop.xlane.xlu0 %946  ;;  %v953_v51 = vpop.xlane.xlu1 %952  ;;  %v988_v8 = vmul.f32 %v1777_v47, %v2390_v29 }
 0x34c   : > { %1786 = vrcp.f32 %v947_v19 }
 0x34d   : > { %v1102_v54 = vmul.f32 %v2515_v48, %v1085_v49  ;;  %1788 = vrcp.f32 %v953_v51 }
 0x34e   : > { %v1779_v58 = vpop.eup %1778 }
 0x34f   : > { %v1781_v60 = vpop.eup %1780  ;;  %v1134_v63 = vadd.f32 %v1118_v53, %v1102_v54  ;;  %v1083_v2 = vmul.f32 %v1779_v58, %v2440_v5  ;;  %v959_v4 = vpop.xlane.xlu0 %958  ;;  %v1119_v5 = vld [vmem:[%s2248_s7 + $0x18] sm:$0xff] }
 0x350   : > { %v949_v7 = vpop.xlane.xlu1 %948  ;;  %v989_v3 = vmul.f32 %v1781_v60, %v2384_v24  ;;  %v1086_v12 = vmul.f32 %v1781_v60, %v2442_v6  ;;  %1790 = vrcp.f32 %v959_v4  ;;  %v986_v24 = vmul.f32 %v1779_v58, %v2382_v21  ;;  %v1123_v60 = vld [vmem:[%s2248_s7 + $0x38] sm:$0xff] }
 0x351   : > { %1150 = vst [vmem:[%s2526_s10 + $0x10] sm:$0xff] %v1134_v63  ;;  %v1100_v15 = vmul.f32 %v2515_v48, %v1083_v2  ;;  %1792 = vrcp.f32 %v949_v7 }
 0x352   : > { %v1783_v16 = vpop.eup %1782  ;;  %v1495_v29 = vpack.c.bf16 %v989_v3, %v988_v8  ;;  %v1103_v20 = vmul.f32 %v2515_v48, %v1086_v12  ;;  %v1126_v3 = vld [vmem:[%s2248_s7 + $0x50] sm:$0xff] }
 0x353   : > { %v1132_v6 = vadd.f32 %v1116_v10, %v1100_v15  ;;  %v987_v22 = vmul.f32 %v1783_v16, %v2388_v28  ;;  %v1084_v26 = vmul.f32 %v1783_v16, %v2450_v9  ;;  %v955_v27 = vpop.xlane.xlu0 %954  ;;  %v1121_v16 = vld [vmem:[%s2248_s7 + $0x28] sm:$0xff] }
 0x354   : > { %v961_v32 = vpop.xlane.xlu1 %960  ;;  %1527 = vst [vmem:[%s2536_s20 + $0x8] sm:$0xff] %v1495_v29   ;;  %v1135_v34 = vadd.f32 %v1119_v5, %v1103_v20  ;;  %1794 = vrcp.f32 %v955_v27 }
 0x355   : > { %v1785_v38 = vpop.eup %1784  ;;  %1148 = vst [vmem:[%s2526_s10] sm:$0xff] %v1132_v6  ;;  %v1490_v21 = vpack.c.bf16 %v987_v22, %v986_v24  ;;  %v1101_v39 = vmul.f32 %v2515_v48, %v1084_v26  ;;  %1796 = vrcp.f32 %v961_v32  ;;  %v1124_v26 = vld [vmem:[%s2248_s7 + $0x40] sm:$0xff] }
 0x356   : > { %1151 = vst [vmem:[%s2526_s10 + $0x18] sm:$0xff] %v1135_v34  ;;  %v1089_v28 = vmul.f32 %v1785_v38, %v2455_v11  ;;  %v992_v51 = vmul.f32 %v1785_v38, %v2406_v50  ;;  %v1120_v11 = vld [vmem:[%s2248_s7 + $0x20] sm:$0xff] }
 0x357   : > { %1491 = vst [vmem:[%s2536_s20] sm:$0xff] %v1490_v21   ;;  %v1133_v9 = vadd.f32 %v1117_v37, %v1101_v39  ;;  %v1127_v37 = vld [vmem:[%s2248_s7 + $0x58] sm:$0xff] }
 0x358   : > { %v957_v41 = vpop.xlane.xlu1 %956  ;;  %v1106_v42 = vmul.f32 %v2515_v48, %v1089_v28 }
 0x359   : > { %1798 = vrcp.f32 %v957_v41  ;;  %v1787_v43 = vpop.eup %1786  ;;  %1149 = vst [vmem:[%s2526_s10 + $0x8] sm:$0xff] %v1133_v9  ;;  %v963_v46 = vpop.xlane.xlu0 %962 }
 0x35a   : > { %v1789_v47 = vpop.eup %1788  ;;  %v1138_v49 = vadd.f32 %v1122_v40, %v1106_v42  ;;  %v1087_v19 = vmul.f32 %v1787_v43, %v2460_v13  ;;  %1800 = vrcp.f32 %v963_v46  ;;  %v990_v8 = vmul.f32 %v1787_v43, %v2400_v44  ;;  %v1125_v40 = vld [vmem:[%s2248_s7 + $0x48] sm:$0xff] }
 0x35b   : > { %v993_v53 = vmul.f32 %v1789_v47, %v2409_v52  ;;  %v1090_v54 = vmul.f32 %v1789_v47, %v2462_v14 }
 0x35c   : > { %1154 = vst [vmem:[%s2526_s10 + $0x30] sm:$0xff] %v1138_v49  ;;  %v1104_v58 = vmul.f32 %v2515_v48, %v1087_v19 }
 0x35d   : > { %v1791_v63 = vpop.eup %1790  ;;  %v1505_v2 = vpack.c.bf16 %v993_v53, %v992_v51  ;;  %v1107_v4 = vmul.f32 %v2515_v48, %v1090_v54  ;;  %v967_v13 = vpop.xlane.xlu0 %966 }
 0x35e   : > { %v965_v7 = vpop.xlane.xlu1 %964  ;;  %v1793_v50 = vpop.eup %1792  ;;  %v1136_v52 = vadd.f32 %v1120_v11, %v1104_v58  ;;  %v1093_v14 = vmul.f32 %v1791_v63, %v2472_v18  ;;  %1802 = vrcp.f32 %v967_v13  ;;  %v1130_v11 = vld [vmem:[%s2248_s7 + $0x70] sm:$0xff]  ;;  %v1129_v58 = vld [vmem:[%s2248_s7 + $0x68] sm:$0xff]  ;;  %v1131_v13 = vld [vmem:[%s2248_s7 + $0x78] sm:$0xff] }
 0x35f   : > { %1529 = vst [vmem:[%s2536_s20 + $0x18] sm:$0xff] %v1505_v2   ;;  %v1139_v10 = vadd.f32 %v1123_v60, %v1107_v4  ;;  %v991_v12 = vmul.f32 %v1793_v50, %v2402_v45  ;;  %v1088_v15 = vmul.f32 %v1793_v50, %v2470_v17  ;;  %1804 = vrcp.f32 %v965_v7 }
 0x360   : > { %1152 = vst [vmem:[%s2526_s10 + $0x20] sm:$0xff] %v1136_v52  ;;  %v1110_v5 = vmul.f32 %v2515_v48, %v1093_v14  ;;  %v996_v17 = vmul.f32 %v1791_v63, %v2419_v59 }
 0x361   : > { %v1795_v44 = vpop.eup %1794  ;;  %1155 = vst [vmem:[%s2526_s10 + $0x38] sm:$0xff] %v1139_v10  ;;  %v1500_v18 = vpack.c.bf16 %v991_v12, %v990_v8  ;;  %v1105_v29 = vmul.f32 %v2515_v48, %v1088_v15 }
 0x362   : > { %v969_v20 = vpop.xlane.xlu1 %968  ;;  %v1797_v24 = vpop.eup %1796  ;;  %v1142_v45 = vadd.f32 %v1126_v3, %v1110_v5  ;;  %v1091_v6 = vmul.f32 %v1795_v44, %v2480_v23  ;;  %v994_v21 = vmul.f32 %v1795_v44, %v2413_v55  ;;  %v1128_v55 = vld [vmem:[%s2248_s7 + $0x60] sm:$0xff]  ;;  %s1920_s7 = scalar_lea.vmem %s2615_s12, 1024 }
 0x363   : > { %1806 = vrcp.f32 %v969_v20  ;;  %1528 = vst [vmem:[%s2536_s20 + $0x10] sm:$0xff] %v1500_v18   ;;  %v1137_v22 = vadd.f32 %v1121_v16, %v1105_v29  ;;  %v997_v27 = vmul.f32 %v1797_v24, %v2421_v57  ;;  %v1094_v32 = vmul.f32 %v1797_v24, %v2482_v25  ;;  %p1921_p8 = scmp.ne.s32.totalorder %s2615_s12, %s1920_s7  ;;  %p1928_p4 = scmp.lt.s32.totalorder %s1926_s30, %s1920_s7 }
 0x364   : > { %1158 = vst [vmem:[%s2526_s10 + $0x50] sm:$0xff] %v1142_v45  ;;  %v1108_v34 = vmul.f32 %v2515_v48, %v1091_v6 }
 0x365   : > { %1153 = vst [vmem:[%s2526_s10 + $0x28] sm:$0xff] %v1137_v22  ;;  %v1515_v23 = vpack.c.bf16 %v997_v27, %v996_v17  ;;  %v1111_v59 = vmul.f32 %v2515_v48, %v1094_v32  ;;  %p1922_p0 = pnand %p1921_p8, %p2147_p9  ;;  %p1929_p5 = por %p1928_p4, %p1927_p3 }
 0x366   : > { %v1799_v38 = vpop.eup %1798  ;;  %v1140_v39 = vadd.f32 %v1124_v26, %v1108_v34 }
 0x367   : > { %v995_v57 = vmul.f32 %v1799_v38, %v2415_v56  ;;  %v1092_v25 = vmul.f32 %v1799_v38, %v2490_v30  ;;  %v1801_v28 = vpop.eup %1800  ;;  %1531 = vst [vmem:[%s2536_s20 + $0x28] sm:$0xff] %v1515_v23   ;;  %v1143_v9 = vadd.f32 %v1127_v37, %v1111_v59  ;;  %p1923_p1 = pneg %p1922_p0 }
 0x368   : > { %1156 = vst [vmem:[%s2526_s10 + $0x40] sm:$0xff] %v1140_v39  ;;  %v1095_v43 = vmul.f32 %v1801_v28, %v2497_v33  ;;  %v998_v51 = vmul.f32 %v1801_v28, %v2425_v61 }
 0x369   : > { %v1510_v41 = vpack.c.bf16 %v995_v57, %v994_v21  ;;  %v1109_v42 = vmul.f32 %v2515_v48, %v1092_v25  ;;  %1159 = vst [vmem:[%s2526_s10 + $0x58] sm:$0xff] %v1143_v9  ;;  %p1930_p6 = pnand %p1929_p5, %p1923_p1 }
 0x36a   : > { %v1112_v30 = vmul.f32 %v2515_v48, %v1095_v43 }
 0x36b   : > { %1530 = vst [vmem:[%s2536_s20 + $0x20] sm:$0xff] %v1510_v41   ;;  %v1141_v56 = vadd.f32 %v1125_v40, %v1109_v42  ;;  %v1803_v46 = vpop.eup %1802 }
 0x36c   : > { %v1805_v47 = vpop.eup %1804  ;;  %v1144_v49 = vadd.f32 %v1128_v55, %v1112_v30  ;;  %v1097_v19 = vmul.f32 %v1803_v46, %v2492_v31  ;;  %v1000_v31 = vmul.f32 %v1803_v46, %v2431_v0 }
 0x36d   : > { %1157 = vst [vmem:[%s2526_s10 + $0x48] sm:$0xff] %v1141_v56  ;;  %v999_v33 = vmul.f32 %v1805_v47, %v2427_v62  ;;  %v1096_v53 = vmul.f32 %v1805_v47, %v2504_v36 }
 0x36e   : > { %1160 = vst [vmem:[%s2526_s10 + $0x60] sm:$0xff] %v1144_v49  ;;  %v1114_v54 = vmul.f32 %v2515_v48, %v1097_v19 }
 0x36f   : > { %v1520_v63 = vpack.c.bf16 %v999_v33, %v998_v51  ;;  %v1113_v61 = vmul.f32 %v2515_v48, %v1096_v53 }
 0x370   : > { %v1807_v60 = vpop.eup %1806  ;;  %v1146_v62 = vadd.f32 %v1130_v11, %v1114_v54 }
 0x371   : > { %v1001_v36 = vmul.f32 %v1807_v60, %v2433_v1  ;;  %v1098_v2 = vmul.f32 %v1807_v60, %v2502_v35  ;;  %1532 = vst [vmem:[%s2536_s20 + $0x30] sm:$0xff] %v1520_v63   ;;  %v1145_v4 = vadd.f32 %v1129_v58, %v1113_v61 }
 0x372   : > { %1162 = vst [vmem:[%s2526_s10 + $0x70] sm:$0xff] %v1146_v62 }
 0x373   : > { %v1525_v0 = vpack.c.bf16 %v1001_v36, %v1000_v31  ;;  %v1115_v1 = vmul.f32 %v2515_v48, %v1098_v2  ;;  %1161 = vst [vmem:[%s2526_s10 + $0x68] sm:$0xff] %v1145_v4 }
 0x375   : > { %1533 = vst [vmem:[%s2536_s20 + $0x38] sm:$0xff] %v1525_v0   ;;  %v1147_v35 = vadd.f32 %v1131_v13, %v1115_v1 }
 0x376   : > { %1933 = shalt.err (!%p1930_p6)
}
 0x377   : > { %s1934_s8 = scalar_lea.hbm %s2613_s23, 1024  ;;  %s1938_s9 = scalar_lea.hbm %s2704_s6, 2048 }
 0x378   : > { %p1935_p7 = scmp.ne.s32.totalorder %s2613_s23, %s1934_s8  ;;  %p1939_p2 = scmp.lt.s32.totalorder %s2613_s23, %s2704_s6 }
 0x379   : > { %p1940_p8 = scmp.lt.s32.totalorder %s1938_s9, %s1934_s8 }
 0x37a   : > { %p1936_p10 = pnand %p1935_p7, %p2147_p9 }
 0x37b   : > { %p1941_p0 = por %p1940_p8, %p1939_p2 }
 0x37c   : > { %p1937_p13 = pneg %p1936_p10 }
 0x37e   : > { %p1942_p1 = pnand %p1941_p0, %p1937_p13 }
 0x380   : > { %1945 = shalt.err (!%p1942_p1)
}
 0x381   : > { %s2049_s1 = smov 64   ;;  %s2050_s0 = smov 4   ;;  %1163 = vst [vmem:[%s2526_s10 + $0x78] sm:$0xff] %v1147_v35 }
 0x382   : > { %1639 = dma.vmem_to_hbm [thread:$0]  (%p2147_p9), %s2615_s12, 1024, %s2613_s23, %s1170_s18, %s2049_s1, %s2049_s1, %s2050_s0  }
 0x383   : > { %s1165_s21 = scalar_lea.sflag [#allocation5], %s2242_s14  ;;  %s1946_s29 = scalar_lea.vmem %s2625_s22, 2048 }
 0x384   : > { %p1947_p3 = scmp.ne.s32.totalorder %s2625_s22, %s1946_s29  ;;  %s2051_s26 = smov [#allocation11]  }
 0x385   : > { %s1950_s19 = sshll.u32 %s2051_s26, 4  ;;  %s1951_s19 = int_to_ptr.vmem [resolvable:$false] %s1950_s19 }
 0x386   : > { %p1948_p4 = pnand %p1947_p3, %p2147_p9  ;;  %s1952_s7 = scalar_lea.vmem %s1951_s19, 4096 }
 0x387   : > { %p1953_p6 = scmp.lt.s32.totalorder %s2625_s22, %s1951_s19  ;;  %p1954_p7 = scmp.lt.s32.totalorder %s1952_s7, %s1946_s29 }
 0x388   : > { %p1949_p5 = pneg %p1948_p4 }
 0x389   : > { %p1955_p10 = por %p1954_p7, %p1953_p6 }
 0x38b   : > { %p1956_p13 = pnand %p1955_p10, %p1949_p5 }
 0x38d   : > { %1959 = shalt.err (!%p1956_p13)
}
 0x38e   : > { %s1960_s10 = scalar_lea.hbm %s2623_s16, 2048  ;;  %s1964_s18 = scalar_lea.hbm %s2703_s5, 4096 }
 0x38f   : > { %p1961_p2 = scmp.ne.s32.totalorder %s2623_s16, %s1960_s10  ;;  %p1965_p1 = scmp.lt.s32.totalorder %s2623_s16, %s2703_s5 }
 0x390   : > { %p1966_p3 = scmp.lt.s32.totalorder %s1964_s18, %s1960_s10 }
 0x391   : > { %p1962_p8 = pnand %p1961_p2, %p2147_p9 }
 0x392   : > { %p1967_p4 = por %p1966_p3, %p1965_p1 }
 0x393   : > { %p1963_p0 = pneg %p1962_p8 }
 0x395   : > { %p1968_p5 = pnand %p1967_p4, %p1963_p0 }
 0x397   : > { %1971 = shalt.err (!%p1968_p5)
}
 0x398   : > { %s2052_s30 = smov 128   ;;  %s2053_s8 = smov 8  }
 0x399   : > { %1638 = dma.vmem_to_hbm [thread:$0]  (%p2147_p9), %s2625_s22, 2048, %s2623_s16, %s1165_s21, %s2052_s30, %s2052_s30, %s2053_s8  }
 0x39a PF: > { %s2730_s25 = sld [smem:[#allocation19_spill]]  ;;  %p1656_p6 = pnand %p1397_p12, %p2154_p11 }
 0x39c   : > { %p1657_p7 = pneg %p1656_p6 }
 0x3a0   : > { %s1218_s9 = sand.u32 1, %s2730_s25  }
 0x3a1   : > { %s1219_s28 = scalar_lea.sflag [#allocation5], %s1218_s9 }
 0x3a2   : > { %2009 = dma.done.wait (%p1657_p7), %s1219_s28, 2048  }
 0x3a3   : > { %2011 = vsyncadd (%p1657_p7), %s1219_s28, 4294965248  ;;  %s1228_s20 = scalar_lea.sflag [#allocation13], %s1218_s9 }
 0x3a4   : > { %2013 = dma.done.wait (%p1657_p7), %s1228_s20, 1024  }
 0x3a5   : > { %2015 = vsyncadd (%p1657_p7), %s1228_s20, 4294966272  ;;  %s33_s4 = sadd.s32 1, %s2038_s4   ;;  %s2732_s11 = sld [smem:[#allocation20_spill]] }
 0x3a6   : > { %p30_p10 = scmp.ge.s32.totalorder %s33_s4, 4   ;;  %s2733_s25 = sld [smem:[#allocation22_spill]] }
 0x3a7   : > { %s2734_s14 = sld [smem:[#allocation21_spill]]  ;;  %s2735_s23 = smov %s2022_s24 }
 0x3a8   : > { %s2737_s26 = smov %s2034_s27 }
 0x3a9   :  { %32 = sbr.rel (!%p30_p10) target bundleno = 16 (0x10), region = 139 }
 0x3ab   : > { %s2736_s24 = smov %s2732_s11 }
 0x3ad   : > { %s2738_s27 = smov %s2734_s14 }
 0x3ae   :  { %1233 = vsyncpa [#allocation4], 1 }
 0x3af   :  { %1235 = vsyncpa [#allocation4 + $0x1], 1 }
 0x3b0   :  { %1236 = vsyncpa [#allocation7], 1 }
 0x3b1   :  { %1238 = vsyncpa [#allocation7 + $0x1], 1 }
 0x3b2   :  { %1239 = vsyncpa [#allocation10], 1 }
 0x3b3   :  { %1241 = vsyncpa [#allocation10 + $0x1], 1 }
 0x3b4   :  { %1242 = vsyncpa [#allocation5], 1 }
 0x3b5   :  { %1244 = vsyncpa [#allocation5 + $0x1], 1 }
 0x3b6   :  { %1245 = vsyncpa [#allocation13], 1 }
 0x3b7   :  { %1247 = vsyncpa [#allocation13 + $0x1], 1 }

</bundles_post_ra>
